<compile_context>
chip_gen: v5e
topology: v5e:2x2
jax: 0.10.0
libtpu: 0.0.40
codegen_flags: <defaults>
</compile_context>

<pallas_src>
import math

import jax
import jax.numpy as jnp
from jax.experimental import pallas as pl
from jax.experimental.pallas import tpu as pltpu

HEAD_W = 128  # lane-dense head / output width


def make_actor_critic_kernel(num_actions):
    def kernel(x_ref, g_ref, w1_ref, b1_ref, w2_ref, b2_ref, w3_ref, b3_ref,
               out_ref):
        # ---- fused actor|critic MLP: 3 matmuls, 2 tanh passes (bf16 MXU, f32 acc)
        x = x_ref[...].astype(jnp.bfloat16)
        h1 = jnp.tanh(jnp.dot(x, w1_ref[...],
                              preferred_element_type=jnp.float32) + b1_ref[...])
        h2 = jnp.tanh(jnp.dot(h1.astype(jnp.bfloat16), w2_ref[...],
                              preferred_element_type=jnp.float32) + b2_ref[...])
        head = (jnp.dot(h2.astype(jnp.bfloat16), w3_ref[...],
                        preferred_element_type=jnp.float32) + b3_ref[...])  # (TB,128)

        tb, hw = head.shape
        col = jax.lax.broadcasted_iota(jnp.int32, (tb, hw), 1)
        is_logit = jnp.logical_and(col >= 1, col < 1 + num_actions)
        neg = jnp.float32(-1e30)

        # ---- masked, numerically stable log_softmax over the logit columns ----
        logits = jnp.where(is_logit, head, neg)
        m = jnp.max(logits, axis=-1, keepdims=True)
        z = logits - m
        p = jnp.where(is_logit, jnp.exp(z), 0.0)
        lse = jnp.log(jnp.sum(p, axis=-1, keepdims=True))
        log_probs = z - lse                                   # valid on logit cols

        # ---- Categorical sample via Gumbel-max (noise supplied from wrapper) ----
        scores = jnp.where(is_logit, log_probs + g_ref[...], neg)
        smax = jnp.max(scores, axis=-1, keepdims=True)
        cand = jnp.where(scores >= smax, col, jnp.int32(hw))
        action_col = jnp.min(cand, axis=-1, keepdims=True)    # in [1, 1+A)
        action_f = (action_col - 1).astype(jnp.float32)       # action index as f32

        logp = jnp.sum(jnp.where(col == action_col, log_probs, 0.0),
                       axis=-1, keepdims=True)
        value = head[:, 0:1]

        # ---- single lane-dense packed store: col0=value, col1=logp, col2=action ----
        out_ref[...] = (jnp.where(col == 0, value, 0.0)
                        + jnp.where(col == 1, logp, 0.0)
                        + jnp.where(col == 2, action_f, 0.0))
    return kernel


def _orthogonal(key, shape, gain):
    return jax.nn.initializers.orthogonal(scale=gain)(key, shape, jnp.float32)


def init_params(num_inputs, hidden_size, num_outputs, key):
    g2 = math.sqrt(2.0)
    ks = jax.random.split(key, 6)
    return {
        # actor: Linear -> Tanh -> Linear -> Tanh
        "wa1": _orthogonal(ks[0], (num_inputs, hidden_size), g2),
        "ba1": jnp.zeros((1, hidden_size), jnp.float32),
        "wa2": _orthogonal(ks[1], (hidden_size, hidden_size), g2),
        "ba2": jnp.zeros((1, hidden_size), jnp.float32),
        # critic: Linear -> Tanh -> Linear -> Tanh
        "wc1": _orthogonal(ks[2], (num_inputs, hidden_size), g2),
        "bc1": jnp.zeros((1, hidden_size), jnp.float32),
        "wc2": _orthogonal(ks[3], (hidden_size, hidden_size), g2),
        "bc2": jnp.zeros((1, hidden_size), jnp.float32),
        # critic_linear
        "wv": _orthogonal(ks[4], (hidden_size, 1), g2),
        "bv": jnp.zeros((1, 1), jnp.float32),
        # Categorical dist head (gain 0.01, as in the PPO Categorical)
        "wd": _orthogonal(ks[5], (hidden_size, num_outputs), 0.01),
        "bd": jnp.zeros((1, num_outputs), jnp.float32),
    }


def fuse_params(params, num_outputs, head_width=HEAD_W):
    """Fuse critic|actor branches into block-diagonal weights (done once)."""
    H = params["wa1"].shape[1]
    A = num_outputs
    assert 1 + A <= head_width
    H2 = 2 * H

    w1 = jnp.concatenate([params["wc1"], params["wa1"]], axis=1)     # (in, 2H)
    b1 = jnp.concatenate([params["bc1"], params["ba1"]], axis=1)     # (1, 2H)

    w2 = jnp.zeros((H2, H2), jnp.float32)
    w2 = w2.at[:H, :H].set(params["wc2"]).at[H:, H:].set(params["wa2"])
    b2 = jnp.concatenate([params["bc2"], params["ba2"]], axis=1)     # (1, 2H)

    w3 = jnp.zeros((H2, head_width), jnp.float32)
    w3 = w3.at[:H, 0:1].set(params["wv"]).at[H:, 1:1 + A].set(params["wd"])
    b3 = jnp.zeros((1, head_width), jnp.float32)
    b3 = b3.at[:, 0:1].set(params["bv"]).at[:, 1:1 + A].set(params["bd"])

    # weights bf16 (single-pass MXU, half the DMA); biases stay f32
    return {"w1": w1.astype(jnp.bfloat16), "b1": b1,
            "w2": w2.astype(jnp.bfloat16), "b2": b2,
            "w3": w3.astype(jnp.bfloat16), "b3": b3}


def simple_actor_critic_forward(x, fused, key, *, num_outputs):
    B, num_inputs = x.shape
    head_w = fused["w3"].shape[1]

    # batch tile: whole batch if small, else 128-row tiles (pad to a multiple)
    TB = B if B <= 128 else 128
    Bp = pl.cdiv(B, TB) * TB
    if Bp != B:
        x = jnp.pad(x, ((0, Bp - B), (0, 0)))

    gumbel = jax.random.gumbel(key, (Bp, head_w), dtype=jnp.float32)

    kernel = make_actor_critic_kernel(num_outputs)
    full = lambda a: pl.BlockSpec(a.shape, lambda i: (0, 0))
    in_specs = [
        pl.BlockSpec((TB, num_inputs), lambda i: (i, 0)),   # x
        pl.BlockSpec((TB, head_w), lambda i: (i, 0)),       # gumbel noise
        full(fused["w1"]), full(fused["b1"]),
        full(fused["w2"]), full(fused["b2"]),
        full(fused["w3"]), full(fused["b3"]),
    ]
    out_specs = pl.BlockSpec((TB, head_w), lambda i: (i, 0))

    packed = pl.pallas_call(
        kernel,
        out_shape=jax.ShapeDtypeStruct((Bp, head_w), jnp.float32),
        grid=(Bp // TB,),
        in_specs=in_specs,
        out_specs=out_specs,
        compiler_params=pltpu.CompilerParams(
            dimension_semantics=("parallel",)),
    )(x, gumbel, fused["w1"], fused["b1"], fused["w2"], fused["b2"],
      fused["w3"], fused["b3"])

    packed = packed[:B]
    value = packed[:, 0:1]                                   # (B, 1) f32
    action_log_probs = packed[:, 1:2]                        # (B, 1) f32
    # TODO(synk): PyTorch Categorical.sample() returns int64; int32 is used here.
    action = packed[:, 2:3].astype(jnp.int32)                # (B, 1) i32
    return value, action, action_log_probs


if __name__ == "__main__":
    num_inputs, hidden_size, num_outputs = 32, 32, 6
    batch = 8

    key = jax.random.PRNGKey(0)
    k_x, k_p, k_s = jax.random.split(key, 3)
    x = jax.random.normal(k_x, (batch, num_inputs), dtype=jnp.float32)
    params = init_params(num_inputs, hidden_size, num_outputs, k_p)
    fused = fuse_params(params, num_outputs)

    fwd = jax.jit(simple_actor_critic_forward, static_argnames=("num_outputs",))
    value, action, action_log_probs = fwd(x, fused, k_s, num_outputs=num_outputs)
    jax.block_until_ready((value, action, action_log_probs))

    assert value.shape == (batch, 1)
    assert action.shape == (batch, 1)
    assert action_log_probs.shape == (batch, 1)
    assert bool(jnp.all(jnp.isfinite(value)))
    assert bool(jnp.all((action >= 0) & (action < num_outputs)))
    assert bool(jnp.all(action_log_probs <= 0.0))
    print("KERNEL_OK")
</pallas_src>

<mosaic_0001>
module attributes {stable_mosaic.version = 11 : i64} {
  func.func @kernel(%arg0: i32, %arg1: memref<8x32xf32, #tpu.memory_space<vmem>>, %arg2: memref<8x128xf32, #tpu.memory_space<vmem>>, %arg3: memref<32x64xbf16, #tpu.memory_space<vmem>>, %arg4: memref<1x64xf32, #tpu.memory_space<vmem>>, %arg5: memref<64x64xbf16, #tpu.memory_space<vmem>>, %arg6: memref<1x64xf32, #tpu.memory_space<vmem>>, %arg7: memref<64x128xbf16, #tpu.memory_space<vmem>>, %arg8: memref<1x128xf32, #tpu.memory_space<vmem>>, %arg9: memref<8x128xf32, #tpu.memory_space<vmem>>) attributes {dimension_semantics = [#tpu.dimension_semantics<parallel>], iteration_bounds = array<i64: 1>, scalar_prefetch = 0 : i64, scratch_operands = 0 : i64, tpu.core_type = #tpu.core_type<tc>, window_params = [{transform_indices = @transform_0, window_bounds = array<i64: 8, 32>}, {transform_indices = @transform_1, window_bounds = array<i64: 8, 128>}, {pipeline_mode = #tpu.pipeline_mode<synchronous>, transform_indices = @transform_2, window_bounds = array<i64: 32, 64>}, {pipeline_mode = #tpu.pipeline_mode<synchronous>, transform_indices = @transform_3, window_bounds = array<i64: 1, 64>}, {pipeline_mode = #tpu.pipeline_mode<synchronous>, transform_indices = @transform_4, window_bounds = array<i64: 64, 64>}, {pipeline_mode = #tpu.pipeline_mode<synchronous>, transform_indices = @transform_5, window_bounds = array<i64: 1, 64>}, {pipeline_mode = #tpu.pipeline_mode<synchronous>, transform_indices = @transform_6, window_bounds = array<i64: 64, 128>}, {pipeline_mode = #tpu.pipeline_mode<synchronous>, transform_indices = @transform_7, window_bounds = array<i64: 1, 128>}, {transform_indices = @transform_8, window_bounds = array<i64: 8, 128>}]} {
    %c0 = arith.constant 0 : index
    %c0_0 = arith.constant 0 : index
    %0 = vector.load %arg1[%c0, %c0_0] : memref<8x32xf32, #tpu.memory_space<vmem>>, vector<8x32xf32>
    %1 = arith.truncf %0 : vector<8x32xf32> to vector<8x32xbf16>
    %c0_1 = arith.constant 0 : index
    %c0_2 = arith.constant 0 : index
    %2 = vector.load %arg3[%c0_1, %c0_2] : memref<32x64xbf16, #tpu.memory_space<vmem>>, vector<32x64xbf16>
    %cst = arith.constant dense<0.000000e+00> : vector<8x64xf32>
    %3 = tpu.matmul %1, %2, %cst {dimension_numbers = #tpu.dot_dimension_numbers<[1], [0], [0], [1], [0, 0, 1, 1], [], []>} : vector<8x32xbf16>, vector<32x64xbf16>, vector<8x64xf32> -> vector<8x64xf32>
    %c0_3 = arith.constant 0 : index
    %c0_4 = arith.constant 0 : index
    %4 = vector.load %arg4[%c0_3, %c0_4] : memref<1x64xf32, #tpu.memory_space<vmem>>, vector<1x64xf32>
    %5 = vector.broadcast %4 : vector<1x64xf32> to vector<8x64xf32>
    %6 = arith.addf %3, %5 : vector<8x64xf32>
    %7 = math.tanh %6 : vector<8x64xf32>
    %8 = arith.truncf %7 : vector<8x64xf32> to vector<8x64xbf16>
    %c0_5 = arith.constant 0 : index
    %c0_6 = arith.constant 0 : index
    %9 = vector.load %arg5[%c0_5, %c0_6] : memref<64x64xbf16, #tpu.memory_space<vmem>>, vector<64x64xbf16>
    %cst_7 = arith.constant dense<0.000000e+00> : vector<8x64xf32>
    %10 = tpu.matmul %8, %9, %cst_7 {dimension_numbers = #tpu.dot_dimension_numbers<[1], [0], [0], [1], [0, 0, 1, 1], [], []>} : vector<8x64xbf16>, vector<64x64xbf16>, vector<8x64xf32> -> vector<8x64xf32>
    %c0_8 = arith.constant 0 : index
    %c0_9 = arith.constant 0 : index
    %11 = vector.load %arg6[%c0_8, %c0_9] : memref<1x64xf32, #tpu.memory_space<vmem>>, vector<1x64xf32>
    %12 = vector.broadcast %11 : vector<1x64xf32> to vector<8x64xf32>
    %13 = arith.addf %10, %12 : vector<8x64xf32>
    %14 = math.tanh %13 : vector<8x64xf32>
    %15 = arith.truncf %14 : vector<8x64xf32> to vector<8x64xbf16>
    %c0_10 = arith.constant 0 : index
    %c0_11 = arith.constant 0 : index
    %16 = vector.load %arg7[%c0_10, %c0_11] : memref<64x128xbf16, #tpu.memory_space<vmem>>, vector<64x128xbf16>
    %cst_12 = arith.constant dense<0.000000e+00> : vector<8x128xf32>
    %17 = tpu.matmul %15, %16, %cst_12 {dimension_numbers = #tpu.dot_dimension_numbers<[1], [0], [0], [1], [0, 0, 1, 1], [], []>} : vector<8x64xbf16>, vector<64x128xbf16>, vector<8x128xf32> -> vector<8x128xf32>
    %c0_13 = arith.constant 0 : index
    %c0_14 = arith.constant 0 : index
    %18 = vector.load %arg8[%c0_13, %c0_14] : memref<1x128xf32, #tpu.memory_space<vmem>>, vector<1x128xf32>
    %19 = vector.broadcast %18 : vector<1x128xf32> to vector<8x128xf32>
    %20 = arith.addf %17, %19 : vector<8x128xf32>
    %21 = tpu.iota {dimensions = array<i32: 1>} : vector<8x128xi32>
    %c1_i32 = arith.constant 1 : i32
    %22 = vector.broadcast %c1_i32 : i32 to vector<8x128xi32>
    %23 = arith.cmpi sge, %21, %22 : vector<8x128xi32>
    %c7_i32 = arith.constant 7 : i32
    %24 = vector.broadcast %c7_i32 : i32 to vector<8x128xi32>
    %25 = arith.cmpi slt, %21, %24 : vector<8x128xi32>
    %26 = arith.andi %23, %25 : vector<8x128xi1>
    %cst_15 = arith.constant -1.000000e+30 : f32
    %27 = vector.broadcast %cst_15 : f32 to vector<8x128xf32>
    %28 = arith.select %26, %20, %27 : vector<8x128xi1>, vector<8x128xf32>
    %cst_16 = arith.constant dense<0xFF800000> : vector<8xf32>
    %29 = vector.multi_reduction <maximumf>, %28, %cst_16 [1] : vector<8x128xf32> to vector<8xf32>
    %30 = vector.shape_cast %29 : vector<8xf32> to vector<8x1xf32>
    %31 = vector.broadcast %30 : vector<8x1xf32> to vector<8x128xf32>
    %32 = arith.subf %28, %31 : vector<8x128xf32>
    %33 = math.exp %32 : vector<8x128xf32>
    %cst_17 = arith.constant 0.000000e+00 : f32
    %34 = vector.broadcast %cst_17 : f32 to vector<8x128xf32>
    %35 = arith.select %26, %33, %34 : vector<8x128xi1>, vector<8x128xf32>
    %cst_18 = arith.constant dense<0.000000e+00> : vector<8xf32>
    %36 = vector.multi_reduction <add>, %35, %cst_18 [1] : vector<8x128xf32> to vector<8xf32>
    %37 = vector.shape_cast %36 : vector<8xf32> to vector<8x1xf32>
    %38 = math.log %37 : vector<8x1xf32>
    %39 = vector.broadcast %38 : vector<8x1xf32> to vector<8x128xf32>
    %40 = arith.subf %32, %39 : vector<8x128xf32>
    %c0_19 = arith.constant 0 : index
    %c0_20 = arith.constant 0 : index
    %41 = vector.load %arg2[%c0_19, %c0_20] : memref<8x128xf32, #tpu.memory_space<vmem>>, vector<8x128xf32>
    %42 = arith.addf %40, %41 : vector<8x128xf32>
    %cst_21 = arith.constant -1.000000e+30 : f32
    %43 = vector.broadcast %cst_21 : f32 to vector<8x128xf32>
    %44 = arith.select %26, %42, %43 : vector<8x128xi1>, vector<8x128xf32>
    %cst_22 = arith.constant dense<0xFF800000> : vector<8xf32>
    %45 = vector.multi_reduction <maximumf>, %44, %cst_22 [1] : vector<8x128xf32> to vector<8xf32>
    %46 = vector.shape_cast %45 : vector<8xf32> to vector<8x1xf32>
    %47 = vector.broadcast %46 : vector<8x1xf32> to vector<8x128xf32>
    %48 = arith.cmpf oge, %44, %47 : vector<8x128xf32>
    %c128_i32 = arith.constant 128 : i32
    %49 = vector.broadcast %c128_i32 : i32 to vector<8x128xi32>
    %50 = arith.select %48, %21, %49 : vector<8x128xi1>, vector<8x128xi32>
    %cst_23 = arith.constant dense<2147483647> : vector<8xi32>
    %51 = vector.multi_reduction <minsi>, %50, %cst_23 [1] : vector<8x128xi32> to vector<8xi32>
    %52 = vector.shape_cast %51 : vector<8xi32> to vector<8x1xi32>
    %c1_i32_24 = arith.constant 1 : i32
    %53 = vector.broadcast %c1_i32_24 : i32 to vector<8x1xi32>
    %54 = arith.subi %52, %53 : vector<8x1xi32>
    %55 = arith.sitofp %54 : vector<8x1xi32> to vector<8x1xf32>
    %56 = vector.broadcast %52 : vector<8x1xi32> to vector<8x128xi32>
    %57 = arith.cmpi eq, %21, %56 : vector<8x128xi32>
    %cst_25 = arith.constant 0.000000e+00 : f32
    %58 = vector.broadcast %cst_25 : f32 to vector<8x128xf32>
    %59 = arith.select %57, %40, %58 : vector<8x128xi1>, vector<8x128xf32>
    %cst_26 = arith.constant dense<0.000000e+00> : vector<8xf32>
    %60 = vector.multi_reduction <add>, %59, %cst_26 [1] : vector<8x128xf32> to vector<8xf32>
    %61 = vector.shape_cast %60 : vector<8xf32> to vector<8x1xf32>
    %62 = vector.extract_strided_slice %20 {offsets = [0, 0], sizes = [8, 1], strides = [1, 1]} : vector<8x128xf32> to vector<8x1xf32>
    %c0_i32 = arith.constant 0 : i32
    %63 = vector.broadcast %c0_i32 : i32 to vector<8x128xi32>
    %64 = arith.cmpi eq, %21, %63 : vector<8x128xi32>
    %cst_27 = arith.constant 0.000000e+00 : f32
    %65 = vector.shape_cast %62 : vector<8x1xf32> to vector<8x1xf32>
    %66 = vector.broadcast %65 : vector<8x1xf32> to vector<8x128xf32>
    %67 = vector.broadcast %cst_27 : f32 to vector<8x128xf32>
    %68 = arith.select %64, %66, %67 : vector<8x128xi1>, vector<8x128xf32>
    %c1_i32_28 = arith.constant 1 : i32
    %69 = vector.broadcast %c1_i32_28 : i32 to vector<8x128xi32>
    %70 = arith.cmpi eq, %21, %69 : vector<8x128xi32>
    %cst_29 = arith.constant 0.000000e+00 : f32
    %71 = vector.shape_cast %61 : vector<8x1xf32> to vector<8x1xf32>
    %72 = vector.broadcast %71 : vector<8x1xf32> to vector<8x128xf32>
    %73 = vector.broadcast %cst_29 : f32 to vector<8x128xf32>
    %74 = arith.select %70, %72, %73 : vector<8x128xi1>, vector<8x128xf32>
    %75 = arith.addf %68, %74 : vector<8x128xf32>
    %c2_i32 = arith.constant 2 : i32
    %76 = vector.broadcast %c2_i32 : i32 to vector<8x128xi32>
    %77 = arith.cmpi eq, %21, %76 : vector<8x128xi32>
    %cst_30 = arith.constant 0.000000e+00 : f32
    %78 = vector.shape_cast %55 : vector<8x1xf32> to vector<8x1xf32>
    %79 = vector.broadcast %78 : vector<8x1xf32> to vector<8x128xf32>
    %80 = vector.broadcast %cst_30 : f32 to vector<8x128xf32>
    %81 = arith.select %77, %79, %80 : vector<8x128xi1>, vector<8x128xf32>
    %82 = arith.addf %75, %81 : vector<8x128xf32>
    %c0_31 = arith.constant 0 : index
    %c0_32 = arith.constant 0 : index
    %83 = vector.load %arg9[%c0_31, %c0_32] : memref<8x128xf32, #tpu.memory_space<vmem>>, vector<8x128xf32>
    tpu.vector_store %arg9[%c0_31, %c0_32], %82 {strides = array<i32>} : memref<8x128xf32, #tpu.memory_space<vmem>>, vector<8x128xf32>,
    return
  }
  func.func @transform_0(%arg0: i32) -> (i32, i32) {
    %c0_i32 = arith.constant 0 : i32
    %c0_i32_0 = arith.constant 0 : i32
    return %arg0, %c0_i32 : i32, i32
  }
  func.func @transform_1(%arg0: i32) -> (i32, i32) {
    %c0_i32 = arith.constant 0 : i32
    %c0_i32_0 = arith.constant 0 : i32
    return %arg0, %c0_i32 : i32, i32
  }
  func.func @transform_2(%arg0: i32) -> (i32, i32) {
    %c0_i32 = arith.constant 0 : i32
    %c0_i32_0 = arith.constant 0 : i32
    %c0_i32_1 = arith.constant 0 : i32
    return %c0_i32, %c0_i32_0 : i32, i32
  }
  func.func @transform_3(%arg0: i32) -> (i32, i32) {
    %c0_i32 = arith.constant 0 : i32
    %c0_i32_0 = arith.constant 0 : i32
    %c0_i32_1 = arith.constant 0 : i32
    return %c0_i32, %c0_i32_0 : i32, i32
  }
  func.func @transform_4(%arg0: i32) -> (i32, i32) {
    %c0_i32 = arith.constant 0 : i32
    %c0_i32_0 = arith.constant 0 : i32
    %c0_i32_1 = arith.constant 0 : i32
    return %c0_i32, %c0_i32_0 : i32, i32
  }
  func.func @transform_5(%arg0: i32) -> (i32, i32) {
    %c0_i32 = arith.constant 0 : i32
    %c0_i32_0 = arith.constant 0 : i32
    %c0_i32_1 = arith.constant 0 : i32
    return %c0_i32, %c0_i32_0 : i32, i32
  }
  func.func @transform_6(%arg0: i32) -> (i32, i32) {
    %c0_i32 = arith.constant 0 : i32
    %c0_i32_0 = arith.constant 0 : i32
    %c0_i32_1 = arith.constant 0 : i32
    return %c0_i32, %c0_i32_0 : i32, i32
  }
  func.func @transform_7(%arg0: i32) -> (i32, i32) {
    %c0_i32 = arith.constant 0 : i32
    %c0_i32_0 = arith.constant 0 : i32
    %c0_i32_1 = arith.constant 0 : i32
    return %c0_i32, %c0_i32_0 : i32, i32
  }
  func.func @transform_8(%arg0: i32) -> (i32, i32) {
    %c0_i32 = arith.constant 0 : i32
    %c0_i32_0 = arith.constant 0 : i32
    return %arg0, %c0_i32 : i32, i32
  }
}

</mosaic_0001>

<bundles_post_ra>
// kernel: simple_actor_critic_forward.1
= control target key start
LH: loop header
LB: loop body
LE: loop exit
PB: predicated region body
PF: predicated region fallthrough
CT: control target
= control target key end

     0   :  { %13 = vsyncpa [#allocation3], 0  ;;  %s489_s0 = inlined_call_operand.vmem [shape: f32[8,32], index: 0, kind: input, shape index: {}]   ;;  %s490_s1 = inlined_call_operand.vmem [shape: f32[8,128], index: 1, kind: input, shape index: {}]   ;;  %s491_s2 = inlined_call_operand.vmem [shape: bf16[32,64], index: 2, kind: input, shape index: {}]   ;;  %s492_s3 = inlined_call_operand.vmem [shape: f32[1,64], index: 3, kind: input, shape index: {}]   ;;  %s493_s4 = inlined_call_operand.hbm [shape: bf16[64,64], index: 4, kind: input, shape index: {}]   ;;  %s494_s5 = inlined_call_operand.vmem [shape: f32[1,64], index: 5, kind: input, shape index: {}]   ;;  %s495_s6 = inlined_call_operand.hbm [shape: bf16[64,128], index: 6, kind: input, shape index: {}]   ;;  %s496_s7 = inlined_call_operand.vmem [shape: f32[1,128], index: 7, kind: input, shape index: {}]   ;;  %s497_s8 = inlined_call_operand.vmem [shape: f32[8,128], index: 8, kind: output, shape index: {}]  }
   0x1   :  { %s27_s29 = sshll.u32 %s493_s4, 4  ;;  %s28_s29 = int_to_ptr.hbm [resolvable:$true] %s27_s29 }
   0x2   :  { %14 = vsyncpa [#allocation5], 0  ;;  %s397_s30 = smov [#allocation2]   ;;  %s42_s12 = sshll.u32 %s495_s6, 4  ;;  %s43_s12 = int_to_ptr.hbm [resolvable:$true] %s42_s12 }
   0x3   :  { %s29_s9 = sshll.u32 %s397_s30, 4  ;;  %s398_s13 = smov 64   ;;  %s30_s9 = int_to_ptr.vmem [resolvable:$true] %s29_s9 }
   0x4   :  { %s399_s14 = smov 4   ;;  %s400_s15 = smov [#allocation4]  }
   0x5   :  { %35 = dma.hbm_to_vmem [thread:$0]  %s28_s29, 512, %s30_s9, [#allocation3], %s398_s13, %s398_s13, %s399_s14  }
   0x6   :  { %s44_s16 = sshll.u32 %s400_s15, 4  ;;  %s45_s16 = int_to_ptr.vmem [resolvable:$true] %s44_s16 }
   0x7   :  { %50 = dma.hbm_to_vmem [thread:$0]  %s43_s12, 512, %s45_s16, [#allocation5], %s398_s13, %s398_s13, %s399_s14  }
   0x8   :  { %393 = dma.done.wait [#allocation3], 512  }
   0x9   :  { %394 = vsyncadd [#allocation3], 4294966784 }
   0xa   :  { %395 = dma.done.wait [#allocation5], 512  }
   0xb   :  { %396 = vsyncadd [#allocation5], 4294966784  ;;  %v319_v0 = vld [vmem:[%s491_s2 + $0x8] sm:$0xff]  ;;  %v318_v1 = vld [vmem:[%s491_s2] sm:$0xff]  ;;  %vm84_vm0 = vcmask 261120   ;;  %vm139_vm1 = vcmask 523264   ;;  %v210_v24 = vlaneseq }
   0xc   :  { %v323_v2 = vld [vmem:[#allocation2 + $0x18] sm:$0xff]  ;;  %94 = vmatpush.bf16.msra.mxu0 %v319_v0  ;;  %v62_v3 = vld [vmem:[%s489_s0] sm:$0xff]  ;;  %v322_v5 = vld [vmem:[#allocation2 + $0x10] sm:$0xff]  ;;  %v401_v32 = vmov 0  }
   0xd   :  { %147 = vmatpush.bf16.msra.mxu1 %v323_v2  ;;  %v63_v4 = vpack.c.bf16 %v62_v3, %v62_v3  ;;  %v321_v6 = vld [vmem:[#allocation2 + $0x8] sm:$0xff]  ;;  %v320_v7 = vld [vmem:[#allocation2] sm:$0xff]  ;;  %v327_v8 = vld [vmem:[#allocation4 + $0x18] sm:$0xff]  ;;  %v211_v25 = vand.u32 127, %v210_v24  ;;  %333 = vset.pattern.permute.xlu0 %v401_v32 }
   0xe   :  { %201 = vmatpush.bf16.msra.mxu2 %v327_v8  ;;  %v334_v9 = vld [vmem:[%s492_s3] ss:$0 sm:$0xff]  ;;  %v326_v15 = vld [vmem:[#allocation4 + $0x10] sm:$0xff]  ;;  %v325_v16 = vld [vmem:[#allocation4 + $0x8] sm:$0xff] }
   0xf   :  { %v324_v17 = vld [vmem:[#allocation4] sm:$0xff]  ;;  %vm212_vm2 = vcmp.ge.s32.totalorder %v211_v25, 1  ;;  %vm213_vm3 = vcmp.lt.s32.totalorder %v211_v25, 7  ;;  %vm254_vm8 = vcmp.eq.s32.totalorder %v211_v25, 0  ;;  %vm261_vm9 = vcmp.eq.s32.totalorder %v211_v25, 1 }
  0x10   :  { %95 = vmatpush.bf16.msra.mxu0 %v318_v1  ;;  %v335_v18 = vld [vmem:[%s494_s5] ss:$0 sm:$0xff]  ;;  %vm473_vm4 = vmand %vm212_vm2, %vm213_vm3  ;;  %vm264_vm10 = vcmp.eq.s32.totalorder %v211_v25, 2 }
  0x11   :  { %148 = vmatpush.bf16.msra.mxu1 %v322_v5  ;;  %v336_v26 = vld [vmem:[%s496_s7] ss:$0 sm:$0xff] }
  0x12   :  { %202 = vmatpush.bf16.msra.mxu2 %v326_v15  ;;  %v227_v41 = vld [vmem:[%s490_s1] sm:$0xff] }
  0x13   :  { %282 = vmatmul.msk.bf16.vlgmr.msra.gmra.mxu0 %vm84_vm0, %v63_v4 }
  0x15   :  { %149 = vmatpush.bf16.msra.mxu1 %v321_v6 }
  0x16   :  { %203 = vmatpush.bf16.msra.mxu2 %v325_v16 }
  0x19   :  { %150 = vmatpush.bf16.msra.mxu1 %v320_v7 }
  0x1a   :  { %204 = vmatpush.bf16.msra.mxu2 %v324_v17 }
  0x90   :  { %v97_v10 = vpop.f32.mrf.mxu0 }
  0x91   :  { %v98_v11 = vadd.f32 %v334_v9, %v97_v10 }
  0x93   :  { %337 = vtanh.f32 %v98_v11 }
  0x98   :  { %v99_v12 = vpop.f32.mrf.mxu0 }
  0x99   :  { %v338_v13 = vpop.eup %337 }
  0x9a   :  { %v102_v14 = vpack.c.bf16 %v338_v13, %v338_v13 }
  0x9c   :  { %299 = vmatmul.msk.bf16.vlgmr.msra.gmra.mxu1 %vm139_vm1, %v102_v14 }
 0x119   :  { %v152_v19 = vpop.f32.mrf.mxu1 }
 0x11a   :  { %v153_v20 = vadd.f32 %v335_v18, %v152_v19 }
 0x11c   :  { %339 = vtanh.f32 %v153_v20 }
 0x121   :  { %v154_v21 = vpop.f32.mrf.mxu1 }
 0x122   :  { %v340_v22 = vpop.eup %339 }
 0x123   :  { %v157_v23 = vpack.c.bf16 %v340_v22, %v340_v22 }
 0x125   :  { %316 = vmatmul.msk.bf16.vlgmr.msra.gmra.mxu2 %vm139_vm1, %v157_v23 }
 0x1a8   :  { %v206_v27 = vpop.f32.mrf.mxu2 }
 0x1a9   :  { %v207_v29 = vadd.f32 %v336_v26, %v206_v27 }
 0x1ab   :  { %v215_v30 = vsel %vm473_vm4, %v207_v29, -1e+30 }
 0x1ac   :  { %216 = vmax.xlane.f32.xlu0 %v215_v30 }
 0x1b0   :  { %v208_v31 = vpop.f32.mrf.mxu2 }
 0x21f   :  { %v217_v33 = vpop.xlane.xlu0 %216 }
 0x220   :  { %v218_v34 = vsub.f32 %v215_v30, %v217_v33 }
 0x222   :  { %v219_v35 = vmul.f32 1.442695, %v218_v34 }
 0x224   :  { %341 = vpow2.f32 %v219_v35 }
 0x22a   :  { %v342_v36 = vpop.eup %341 }
 0x22b   :  { %v221_v37 = vsel %vm473_vm4, %v342_v36, 0.0 }
 0x22c   :  { %222 = vadd.xlane.f32.xlu0 %v221_v37 }
 0x240   :  { %257 = vperm.xlu0 %333, %v207_v29  }
 0x29f   :  { %v223_v38 = vpop.xlane.xlu0 %222 }
 0x2a0   :  { %343 = vlog2.f32 %v223_v38 }
 0x2a6   :  { %v344_v39 = vpop.eup %343 }
 0x2a7   :  { %v225_v40 = vmul.f32 0.6931472, %v344_v39 }
 0x2a9   :  { %v226_v42 = vsub.f32 %v218_v34, %v225_v40 }
 0x2ab   :  { %v228_v43 = vadd.f32 %v227_v41, %v226_v42 }
 0x2ad   :  { %v229_v44 = vsel %vm473_vm4, %v228_v43, -1e+30 }
 0x2ae   :  { %230 = vmax.xlane.f32.xlu1 %v229_v44 }
 0x2b2   :  { %v258_v60 = vpop.permute.xlu0 %257 }
 0x2b3   :  { %v260_v63 = vsel %vm254_vm8, %v258_v60, 0.0 }
 0x321   :  { %v231_v45 = vpop.xlane.xlu1 %230 }
 0x322   :  { %vm232_vm5 = vcmp.ge.f32.partialorder %v229_v44, %v231_v45 }
 0x323   :  { %v233_v46 = vsel %vm232_vm5, %v211_v25, 128 }
 0x324   :  { %v235_v47 = vshra.s32 %v233_v46, 16  ;;  %v234_v49 = vand.u32 65535, %v233_v46 }
 0x326   :  { %v237_v48 = vcvt.s32.f32 %v235_v47  ;;  %v236_v51 = vcvt.s32.f32 %v234_v49 }
 0x328   :  { %238 = vmin.xlane.f32.xlu1 %v237_v48 }
 0x39b   :  { %v239_v50 = vpop.xlane.xlu1 %238 }
 0x39c   :  { %vm240_vm6 = vcmp.eq.f32.partialorder %v237_v48, %v239_v50  ;;  %v245_v53 = vcvt.f32.s32 %v239_v50 }
 0x39d   :  { %v241_v52 = vsel %vm240_vm6, %v236_v51, inf }
 0x39e   :  { %242 = vmin.xlane.f32.xlu2 %v241_v52  ;;  %v246_v55 = vshll.u32 %v245_v53, 16 }
 0x411   :  { %v243_v54 = vpop.xlane.xlu2 %242 }
 0x412   :  { %v244_v56 = vcvt.f32.s32 %v243_v54 }
 0x414   :  { %v247_v57 = vadd.s32 %v246_v55, %v244_v56 }
 0x416   :  { %vm250_vm7 = vcmp.eq.s32.totalorder %v211_v25, %v247_v57  ;;  %v317_v59 = vadd.s32 4294967295, %v247_v57 }
 0x417   :  { %v251_v58 = vsel %vm250_vm7, %v226_v42, 0.0 }
 0x418   :  { %252 = vadd.xlane.f32.xlu2 %v251_v58  ;;  %v249_v61 = vcvt.s32.f32 %v317_v59 }
 0x41a   :  { %v265_v2 = vsel %vm264_vm10, %v249_v61, 0.0 }
 0x48b   :  { %v253_v62 = vpop.xlane.xlu2 %252 }
 0x48c   :  { %v262_v0 = vsel %vm261_vm9, %v253_v62, 0.0 }
 0x48d   :  { %v263_v1 = vadd.f32 %v262_v0, %v260_v63 }
 0x48f   :  { %v266_v3 = vadd.f32 %v265_v2, %v263_v1 }
 0x491   :  { %267 = vst [vmem:[%s497_s8] sm:$0xff] %v266_v3 }
 0x492   :  { %272 = vsyncpa [#allocation3], 1 }
 0x493   :  { %273 = vsyncpa [#allocation5], 1 }

</bundles_post_ra>
